<compile_context>
chip_gen: v7x
topology: tpu7x:2x2x1
jax: 0.10.0
libtpu: 0.0.40
codegen_flags: <defaults>
</compile_context>

<pallas_src>
import jax
import jax.numpy as jnp
import numpy as np
from jax.experimental import pallas as pl
from jax.experimental.pallas import tpu as pltpu

BN_EPS = 1e-5


# ----------------------------------------------------------------------------
# Fused forward kernel:  lin+bn+relu -> lin+bn+relu -> affine conv fold
# ----------------------------------------------------------------------------
def _fused_backprop_kernel(g_ref, w1s_ref, w2s_ref, ms_ref, o_ref, *, F0, H1, H2):
    """Whole Backprop forward in one kernel.

    g_ref:   (B, F0)        input geometry, VMEM.
    w1s_ref: (F0 + 2, H1)   rows [0:F0] = W1, row F0 = gamma1, row F0+1 = beta1.
    w2s_ref: (H1 + 2, H2)   rows [0:H1] = W2, row H1 = gamma2, row H1+1 = beta2.
    ms_ref:  (H2 + 1, Lout) rows [0:H2] = folded conv affine M, row H2 = bias_row.
    o_ref:   (B, Lout)      output spectra.

    Linear biases are omitted: train-mode BatchNorm subtracts the batch mean,
    which exactly cancels any constant added by the fc bias.
    """
    f32 = jnp.float32

    def lin_bn_relu(x, w, gamma, beta):
        y = jnp.dot(x, w, preferred_element_type=f32)
        mean = jnp.mean(y, axis=0, keepdims=True)
        var = jnp.mean((y - mean) ** 2, axis=0, keepdims=True)  # biased (train)
        y = (y - mean) * jax.lax.rsqrt(var + BN_EPS)
        return jnp.maximum(y * gamma + beta, 0.0)

    x = lin_bn_relu(g_ref[...],
                    w1s_ref[:F0, :],
                    w1s_ref[F0:F0 + 1, :],
                    w1s_ref[F0 + 1:F0 + 2, :])                  # (B, H1)
    x0 = lin_bn_relu(x,
                     w2s_ref[:H1, :],
                     w2s_ref[H1:H1 + 1, :],
                     w2s_ref[H1 + 1:H1 + 2, :])                 # (B, H2)

    # Entire conv/interleave stack folded into one affine map (exact).
    o_ref[...] = (jnp.dot(x0, ms_ref[:H2, :], preferred_element_type=f32)
                  + ms_ref[H2:H2 + 1, :])


# ----------------------------------------------------------------------------
# Model: flags, PyTorch-layout params, init-time precomputation
# ----------------------------------------------------------------------------
class Flags:
    eval_batch_size = 2
    linear = [8, 32, 64]
    conv_out_channel = [4, 4]
    conv_kernel_size = [4, 3]
    conv_stride = [2, 1]


def _pytorch_pad(kernel_size, stride):
    if stride == 2:
        return int(kernel_size / 2 - 1)
    return int((kernel_size - 1) / 2)


def init_params(flags, key):
    params = {"linears": [], "bns": [], "convs": []}
    for ind in range(len(flags.linear) - 1):
        fin, fout = flags.linear[ind], flags.linear[ind + 1]
        key, k1, k2 = jax.random.split(key, 3)
        bound = 1.0 / np.sqrt(fin)
        w = jax.random.uniform(k1, (fin, fout), jnp.float32, -bound, bound)
        b = jax.random.uniform(k2, (fout,), jnp.float32, -bound, bound)
        params["linears"].append((w, b))
        # BatchNorm1d fresh init: gamma=1, beta=0 (train-mode batch stats).
        params["bns"].append((jnp.ones((fout,), jnp.float32),
                              jnp.zeros((fout,), jnp.float32)))
    in_ch = 1
    for out_ch, k_sz, stride in zip(flags.conv_out_channel,
                                    flags.conv_kernel_size, flags.conv_stride):
        key, k1, k2 = jax.random.split(key, 3)
        bound = 1.0 / np.sqrt(in_ch * k_sz)
        # PyTorch ConvTranspose1d weight layout: (Cin, Cout, K)
        w = jax.random.uniform(k1, (in_ch, out_ch, k_sz), jnp.float32, -bound, bound)
        b = jax.random.uniform(k2, (out_ch,), jnp.float32, -bound, bound)
        params["convs"].append(("convT", w, b, stride, k_sz))
        in_ch = out_ch
    if len(flags.conv_out_channel):
        key, k1, k2 = jax.random.split(key, 3)
        bound = 1.0 / np.sqrt(in_ch)
        # PyTorch Conv1d weight layout: (Cout=1, Cin, K=1)
        w = jax.random.uniform(k1, (1, in_ch, 1), jnp.float32, -bound, bound)
        b = jax.random.uniform(k2, (1,), jnp.float32, -bound, bound)
        params["convs"].append(("conv1x1", w, b, 1, 1))
    return params


# -- numpy (float64) conv stack used ONLY at init time to build the fold -----
def _conv_transpose_np(x, w_t, b, stride, pad):
    Bn, c_in, L = x.shape
    _, c_out, K = w_t.shape
    L_out = (L - 1) * stride - 2 * pad + K
    if stride > 1:
        xu = np.zeros((Bn, c_in, (L - 1) * stride + 1), dtype=x.dtype)
        xu[:, :, ::stride] = x
    else:
        xu = x
    plr = K - 1 - pad
    xpad = np.pad(xu, ((0, 0), (0, 0), (plr, plr)))
    w_corr = np.transpose(w_t[:, :, ::-1], (2, 1, 0))  # (K, Cout, Cin)
    acc = np.zeros((Bn, c_out, L_out), dtype=x.dtype)
    for t in range(K):
        acc += np.einsum('oc,bcl->bol', w_corr[t], xpad[:, :, t:t + L_out])
    return acc + b.reshape(1, -1, 1)


def _conv_stack_np(params, x64):
    out = x64
    for kind, w, b, stride, k_sz in params["convs"]:
        w = np.asarray(w, np.float64)
        b = np.asarray(b, np.float64)
        if kind == "convT":
            out = _conv_transpose_np(out, w, b, stride, _pytorch_pad(k_sz, stride))
        else:
            out = np.einsum('oc,bcl->bol', w[:, :, 0], out) + b.reshape(1, -1, 1)
    return out  # (B, 1, L_out)


def prepare_params(flags, params):
    """One-time (init-time) transforms:
       * pack each Linear's weight + BN gamma/beta into one VMEM slab
         (fc biases dropped: cancelled exactly by train-mode BatchNorm),
       * fold the whole conv/interleave stack into a single affine map
         S = x0 @ M + bias_row, built in float64 and cast to f32."""
    assert len(params["linears"]) == 2, "kernel specialized to 2 linear layers"
    F0, H1, H2 = flags.linear

    (w1, _b1), (w2, _b2) = params["linears"]
    (g1, be1), (g2, be2) = params["bns"]
    w1s = np.concatenate([np.asarray(w1, np.float32),
                          np.asarray(g1, np.float32).reshape(1, -1),
                          np.asarray(be1, np.float32).reshape(1, -1)], axis=0)
    w2s = np.concatenate([np.asarray(w2, np.float32),
                          np.asarray(g2, np.float32).reshape(1, -1),
                          np.asarray(be2, np.float32).reshape(1, -1)], axis=0)

    # Affine fold of the conv stack: push zero (-> bias_row) and identity
    # rows (-> M) through a float64 reference of the conv path.
    L0 = H2
    zero_in = np.zeros((1, 1, L0), np.float64)
    bias_row = _conv_stack_np(params, zero_in)[:, 0, :]           # (1, L_out)
    eye_in = np.eye(L0, dtype=np.float64)[:, None, :]             # (L0, 1, L0)
    M = _conv_stack_np(params, eye_in)[:, 0, :] - bias_row        # (L0, L_out)
    L_out = M.shape[1]
    ms = np.concatenate([M, bias_row], axis=0).astype(np.float32)  # (H2+1, L_out)

    return dict(w1s=jnp.asarray(w1s), w2s=jnp.asarray(w2s), ms=jnp.asarray(ms),
                F0=F0, H1=H1, H2=H2, L_out=L_out)


# ----------------------------------------------------------------------------
# Forward (single fused pallas_call, 4 input DMAs, no grid)
# ----------------------------------------------------------------------------
def backprop_forward(prep, G):
    # TODO(synk): `self.bp` branch (optimizable `geometry_eval` input) is a
    # training-time feature; forward here uses G (bp=False), as in the module.
    B = G.shape[0]
    vmem = pl.BlockSpec(memory_space=pltpu.MemorySpace.VMEM)

    def kern(g_ref, w1s_ref, w2s_ref, ms_ref, o_ref):
        _fused_backprop_kernel(g_ref, w1s_ref, w2s_ref, ms_ref, o_ref,
                               F0=prep["F0"], H1=prep["H1"], H2=prep["H2"])

    S = pl.pallas_call(
        kern,
        out_shape=jax.ShapeDtypeStruct((B, prep["L_out"]), jnp.float32),
        in_specs=[vmem, vmem, vmem, vmem],
        out_specs=vmem,
    )(G, prep["w1s"], prep["w2s"], prep["ms"])
    # torch .squeeze(): also drops the batch dim when eval_batch_size == 1.
    return jnp.squeeze(S)


# ----------------------------------------------------------------------------
# Pure-jnp reference (independent lowering, faithful to PyTorch incl. biases)
# ----------------------------------------------------------------------------
def _lin_ref(x, w, b, gamma, beta):
    y = x @ w + b
    mean = jnp.mean(y, axis=0, keepdims=True)
    var = jnp.mean((y - mean) ** 2, axis=0, keepdims=True)
    return jnp.maximum((y - mean) * jax.lax.rsqrt(var + BN_EPS) * gamma + beta, 0.0)


def _conv_transpose_ref(x, w_t, b, stride, pad):
    Bn, c_in, L = x.shape
    _, c_out, K = w_t.shape
    L_out = (L - 1) * stride - 2 * pad + K
    if stride > 1:
        xu = jnp.zeros((Bn, c_in, (L - 1) * stride + 1), x.dtype)
        xu = xu.at[:, :, ::stride].set(x)
    else:
        xu = x
    plr = K - 1 - pad
    xpad = jnp.pad(xu, ((0, 0), (0, 0), (plr, plr)))
    w_corr = jnp.transpose(w_t[:, :, ::-1], (2, 1, 0))  # (K, Cout, Cin)
    acc = 0.0
    for t in range(K):
        acc = acc + jnp.einsum('oc,bcl->bol', w_corr[t], xpad[:, :, t:t + L_out])
    return acc + b.reshape(1, -1, 1)


def reference_forward(params, G):
    out = G
    for (w, b), (gamma, beta) in zip(params["linears"], params["bns"]):
        out = _lin_ref(out, w, b, gamma, beta)
    out = out[:, None, :]
    for kind, w, b, stride, k_sz in params["convs"]:
        if kind == "convT":
            out = _conv_transpose_ref(out, w, b, stride, _pytorch_pad(k_sz, stride))
        else:
            out = jnp.einsum('oc,bcl->bol', w[:, :, 0], out) + b.reshape(1, -1, 1)
    return jnp.squeeze(out)


# ----------------------------------------------------------------------------
if __name__ == "__main__":
    flags = Flags()
    key = jax.random.PRNGKey(0)
    kp, kx = jax.random.split(key)
    params = init_params(flags, kp)
    prep = prepare_params(flags, params)

    B = flags.eval_batch_size
    G = jax.random.normal(kx, (B, flags.linear[0]), jnp.float32)

    S = backprop_forward(prep, G)
    S = jax.block_until_ready(S)

    S_ref = reference_forward(params, G)
    assert S.shape == (B, 2 * flags.linear[-1]), S.shape
    np.testing.assert_allclose(np.asarray(S), np.asarray(S_ref),
                               rtol=1e-3, atol=1e-3)
    print("KERNEL_OK")
</pallas_src>

<mosaic_0001>
module attributes {stable_mosaic.version = 11 : i64} {
  func.func @kern(%arg0: memref<2x8xf32, #tpu.memory_space<vmem>>, %arg1: memref<10x32xf32, #tpu.memory_space<vmem>>, %arg2: memref<34x64xf32, #tpu.memory_space<vmem>>, %arg3: memref<65x128xf32, #tpu.memory_space<vmem>>, %arg4: memref<2x128xf32, #tpu.memory_space<vmem>>) attributes {dimension_semantics = [], scalar_prefetch = 0 : i64, scratch_operands = 0 : i64, tpu.core_type = #tpu.core_type<tc>} {
    %c0 = arith.constant 0 : index
    %c0_0 = arith.constant 0 : index
    %0 = vector.load %arg0[%c0, %c0_0] : memref<2x8xf32, #tpu.memory_space<vmem>>, vector<2x8xf32>
    %c0_1 = arith.constant 0 : index
    %c0_2 = arith.constant 0 : index
    %1 = vector.load %arg1[%c0_1, %c0_2] : memref<10x32xf32, #tpu.memory_space<vmem>>, vector<8x32xf32>
    %c8 = arith.constant 8 : index
    %c0_3 = arith.constant 0 : index
    %2 = vector.load %arg1[%c8, %c0_3] : memref<10x32xf32, #tpu.memory_space<vmem>>, vector<1x32xf32>
    %c9 = arith.constant 9 : index
    %c0_4 = arith.constant 0 : index
    %3 = vector.load %arg1[%c9, %c0_4] : memref<10x32xf32, #tpu.memory_space<vmem>>, vector<1x32xf32>
    %cst = arith.constant dense<0.000000e+00> : vector<2x32xf32>
    %4 = tpu.matmul %0, %1, %cst {dimension_numbers = #tpu.dot_dimension_numbers<[1], [0], [0], [1], [0, 0, 1, 1], [], []>} : vector<2x8xf32>, vector<8x32xf32>, vector<2x32xf32> -> vector<2x32xf32>
    %cst_5 = arith.constant dense<0.000000e+00> : vector<32xf32>
    %5 = vector.multi_reduction <add>, %4, %cst_5 [0] : vector<2x32xf32> to vector<32xf32>
    %6 = vector.shape_cast %5 : vector<32xf32> to vector<1x32xf32>
    %cst_6 = arith.constant 2.000000e+00 : f32
    %7 = vector.broadcast %cst_6 : f32 to vector<1x32xf32>
    %8 = arith.divf %6, %7 : vector<1x32xf32>
    %9 = vector.broadcast %8 : vector<1x32xf32> to vector<2x32xf32>
    %10 = arith.subf %4, %9 : vector<2x32xf32>
    %11 = arith.mulf %10, %10 : vector<2x32xf32>
    %cst_7 = arith.constant dense<0.000000e+00> : vector<32xf32>
    %12 = vector.multi_reduction <add>, %11, %cst_7 [0] : vector<2x32xf32> to vector<32xf32>
    %13 = vector.shape_cast %12 : vector<32xf32> to vector<1x32xf32>
    %cst_8 = arith.constant 2.000000e+00 : f32
    %14 = vector.broadcast %cst_8 : f32 to vector<1x32xf32>
    %15 = arith.divf %13, %14 : vector<1x32xf32>
    %16 = vector.broadcast %8 : vector<1x32xf32> to vector<2x32xf32>
    %17 = arith.subf %4, %16 : vector<2x32xf32>
    %cst_9 = arith.constant 9.99999974E-6 : f32
    %18 = vector.broadcast %cst_9 : f32 to vector<1x32xf32>
    %19 = arith.addf %15, %18 : vector<1x32xf32>
    %20 = math.rsqrt %19 : vector<1x32xf32>
    %21 = vector.broadcast %20 : vector<1x32xf32> to vector<2x32xf32>
    %22 = arith.mulf %17, %21 : vector<2x32xf32>
    %23 = vector.broadcast %2 : vector<1x32xf32> to vector<2x32xf32>
    %24 = arith.mulf %22, %23 : vector<2x32xf32>
    %25 = vector.broadcast %3 : vector<1x32xf32> to vector<2x32xf32>
    %26 = arith.addf %24, %25 : vector<2x32xf32>
    %cst_10 = arith.constant 0.000000e+00 : f32
    %27 = vector.broadcast %cst_10 : f32 to vector<2x32xf32>
    %28 = arith.maximumf %26, %27 : vector<2x32xf32>
    %c0_11 = arith.constant 0 : index
    %c0_12 = arith.constant 0 : index
    %29 = vector.load %arg2[%c0_11, %c0_12] : memref<34x64xf32, #tpu.memory_space<vmem>>, vector<32x64xf32>
    %c32 = arith.constant 32 : index
    %c0_13 = arith.constant 0 : index
    %30 = vector.load %arg2[%c32, %c0_13] : memref<34x64xf32, #tpu.memory_space<vmem>>, vector<1x64xf32>
    %c33 = arith.constant 33 : index
    %c0_14 = arith.constant 0 : index
    %31 = vector.load %arg2[%c33, %c0_14] : memref<34x64xf32, #tpu.memory_space<vmem>>, vector<1x64xf32>
    %cst_15 = arith.constant dense<0.000000e+00> : vector<2x64xf32>
    %32 = tpu.matmul %28, %29, %cst_15 {dimension_numbers = #tpu.dot_dimension_numbers<[1], [0], [0], [1], [0, 0, 1, 1], [], []>} : vector<2x32xf32>, vector<32x64xf32>, vector<2x64xf32> -> vector<2x64xf32>
    %cst_16 = arith.constant dense<0.000000e+00> : vector<64xf32>
    %33 = vector.multi_reduction <add>, %32, %cst_16 [0] : vector<2x64xf32> to vector<64xf32>
    %34 = vector.shape_cast %33 : vector<64xf32> to vector<1x64xf32>
    %cst_17 = arith.constant 2.000000e+00 : f32
    %35 = vector.broadcast %cst_17 : f32 to vector<1x64xf32>
    %36 = arith.divf %34, %35 : vector<1x64xf32>
    %37 = vector.broadcast %36 : vector<1x64xf32> to vector<2x64xf32>
    %38 = arith.subf %32, %37 : vector<2x64xf32>
    %39 = arith.mulf %38, %38 : vector<2x64xf32>
    %cst_18 = arith.constant dense<0.000000e+00> : vector<64xf32>
    %40 = vector.multi_reduction <add>, %39, %cst_18 [0] : vector<2x64xf32> to vector<64xf32>
    %41 = vector.shape_cast %40 : vector<64xf32> to vector<1x64xf32>
    %cst_19 = arith.constant 2.000000e+00 : f32
    %42 = vector.broadcast %cst_19 : f32 to vector<1x64xf32>
    %43 = arith.divf %41, %42 : vector<1x64xf32>
    %44 = vector.broadcast %36 : vector<1x64xf32> to vector<2x64xf32>
    %45 = arith.subf %32, %44 : vector<2x64xf32>
    %cst_20 = arith.constant 9.99999974E-6 : f32
    %46 = vector.broadcast %cst_20 : f32 to vector<1x64xf32>
    %47 = arith.addf %43, %46 : vector<1x64xf32>
    %48 = math.rsqrt %47 : vector<1x64xf32>
    %49 = vector.broadcast %48 : vector<1x64xf32> to vector<2x64xf32>
    %50 = arith.mulf %45, %49 : vector<2x64xf32>
    %51 = vector.broadcast %30 : vector<1x64xf32> to vector<2x64xf32>
    %52 = arith.mulf %50, %51 : vector<2x64xf32>
    %53 = vector.broadcast %31 : vector<1x64xf32> to vector<2x64xf32>
    %54 = arith.addf %52, %53 : vector<2x64xf32>
    %cst_21 = arith.constant 0.000000e+00 : f32
    %55 = vector.broadcast %cst_21 : f32 to vector<2x64xf32>
    %56 = arith.maximumf %54, %55 : vector<2x64xf32>
    %c0_22 = arith.constant 0 : index
    %c0_23 = arith.constant 0 : index
    %57 = vector.load %arg3[%c0_22, %c0_23] : memref<65x128xf32, #tpu.memory_space<vmem>>, vector<64x128xf32>
    %cst_24 = arith.constant dense<0.000000e+00> : vector<2x128xf32>
    %58 = tpu.matmul %56, %57, %cst_24 {dimension_numbers = #tpu.dot_dimension_numbers<[1], [0], [0], [1], [0, 0, 1, 1], [], []>} : vector<2x64xf32>, vector<64x128xf32>, vector<2x128xf32> -> vector<2x128xf32>
    %c64 = arith.constant 64 : index
    %c0_25 = arith.constant 0 : index
    %59 = vector.load %arg3[%c64, %c0_25] : memref<65x128xf32, #tpu.memory_space<vmem>>, vector<1x128xf32>
    %60 = vector.broadcast %59 : vector<1x128xf32> to vector<2x128xf32>
    %61 = arith.addf %58, %60 : vector<2x128xf32>
    %c0_26 = arith.constant 0 : index
    %c0_27 = arith.constant 0 : index
    %62 = vector.load %arg4[%c0_26, %c0_27] : memref<2x128xf32, #tpu.memory_space<vmem>>, vector<2x128xf32>
    tpu.vector_store %arg4[%c0_26, %c0_27], %61 {strides = array<i32>} : memref<2x128xf32, #tpu.memory_space<vmem>>, vector<2x128xf32>,
    return
  }
}

</mosaic_0001>

<bundles_post_ra>
// kernel: tpu_custom_call.1
= control target key start
LH: loop header
LB: loop body
LE: loop exit
PB: predicated region body
PF: predicated region fallthrough
CT: control target
= control target key end

     0   :  { %9 = vsyncpa [#allocation3], 0  ;;  %s714_s0 = inlined_call_operand.hbm [shape: f32[2,8], index: 0, kind: input, shape index: {}]   ;;  %s715_s1 = inlined_call_operand.hbm [shape: f32[10,32], index: 1, kind: input, shape index: {}]   ;;  %s716_s2 = inlined_call_operand.hbm [shape: f32[34,64], index: 2, kind: input, shape index: {}]   ;;  %s717_s3 = inlined_call_operand.hbm [shape: f32[65,128], index: 3, kind: input, shape index: {}]   ;;  %s718_s4 = inlined_call_operand.hbm [shape: f32[2,128], index: 4, kind: output, shape index: {}]  }
   0x1   :  { %10 = vsyncpa [#allocation6], 0 }
   0x2   :  { %11 = vsyncpa [#allocation9], 0 }
   0x3   :  { %12 = vsyncpa [#allocation4], 0  ;;  %s610_s15 = smov [#allocation5]   ;;  %s492_s19 = scalar_lea.hbm %s715_s1, 256 }
   0x4   :  { %s28_s16 = sshll.u32 %s610_s15, 4  ;;  %p493_p0 = scmp.ne.s32.totalorder %s715_s1, %s492_s19  ;;  %s29_s16 = int_to_ptr.vmem [resolvable:$true] %s28_s16 }
   0x5   :  { %p496_p1 = scmp.lt.u32.totalorder %s492_s19, %s715_s1 }
   0x7   :  { %p498_p2 = pnand %p496_p1, %p493_p0 }
   0x9   :  { %501 = shalt.err (!%p498_p2)
}
   0xa   :  { %s502_s24 = scalar_lea.vmem %s29_s16, 256  ;;  %p507_p4 = scmp.lt.s32.totalorder %s29_s16, %s29_s16 }
   0xb   :  { %p503_p3 = scmp.ne.s32.totalorder %s29_s16, %s502_s24  ;;  %p508_p5 = scmp.lt.s32.totalorder %s502_s24, %s502_s24 }
   0xd   :  { %p509_p6 = por %p508_p5, %p507_p4 }
   0xf   :  { %p510_p7 = pnand %p509_p6, %p503_p3 }
  0x11   :  { %513 = shalt.err (!%p510_p7)
}
  0x12   :  { %s611_s25 = smov 128   ;;  %s612_s26 = smov 8  }
  0x13   :  { %34 = dma.hbm_to_vmem [thread:$0]  %s715_s1, 256, %s29_s16, [#allocation6], %s611_s25, %s611_s25, %s612_s26  }
  0x14   :  { %s613_s29 = smov [#allocation2]   ;;  %s614_s5 = smov [#allocation7]  }
  0x15   :  { %s19_s30 = sshll.u32 %s613_s29, 4  ;;  %s40_s6 = sshll.u32 %s614_s5, 4  ;;  %s20_s30 = int_to_ptr.vmem [resolvable:$true] %s19_s30  ;;  %s41_s6 = int_to_ptr.vmem [resolvable:$true] %s40_s6 }
  0x16   :  { %s514_s9 = scalar_lea.hbm %s714_s0, 32 }
  0x17   :  { %p515_p8 = scmp.ne.s32.totalorder %s714_s0, %s514_s9  ;;  %p518_p9 = scmp.lt.u32.totalorder %s514_s9, %s714_s0 }
  0x19   :  { %p520_p10 = pnand %p518_p9, %p515_p8 }
  0x1b   :  { %523 = shalt.err (!%p520_p10)
}
  0x1c   :  { %s524_s1 = scalar_lea.vmem %s20_s30, 32  ;;  %p529_p12 = scmp.lt.s32.totalorder %s20_s30, %s20_s30 }
  0x1d   :  { %p525_p11 = scmp.ne.s32.totalorder %s20_s30, %s524_s1  ;;  %p530_p13 = scmp.lt.s32.totalorder %s524_s1, %s524_s1 }
  0x1f   :  { %p531_p0 = por %p530_p13, %p529_p12 }
  0x21   :  { %p532_p1 = pnand %p531_p0, %p525_p11 }
  0x23   :  { %535 = shalt.err (!%p532_p1)
}
  0x24   :  { %22 = dma.hbm_to_vmem [thread:$0]  %s714_s0, 32, %s20_s30, [#allocation3]  }
  0x25   :  { %s536_s18 = scalar_lea.hbm %s716_s2, 640 }
  0x26   :  { %p537_p2 = scmp.ne.s32.totalorder %s716_s2, %s536_s18  ;;  %p540_p3 = scmp.lt.u32.totalorder %s536_s18, %s716_s2 }
  0x28   :  { %p542_p4 = pnand %p540_p3, %p537_p2 }
  0x2a   :  { %545 = shalt.err (!%p542_p4)
}
  0x2b   :  { %s546_s23 = scalar_lea.vmem %s41_s6, 640  ;;  %p551_p6 = scmp.lt.s32.totalorder %s41_s6, %s41_s6 }
  0x2c   :  { %p547_p5 = scmp.ne.s32.totalorder %s41_s6, %s546_s23  ;;  %p552_p7 = scmp.lt.s32.totalorder %s546_s23, %s546_s23 }
  0x2e   :  { %p553_p8 = por %p552_p7, %p551_p6 }
  0x30   :  { %p554_p9 = pnand %p553_p8, %p547_p5 }
  0x32   :  { %557 = shalt.err (!%p554_p9)
}
  0x33   :  { %46 = dma.hbm_to_vmem [thread:$0]  %s716_s2, 640, %s41_s6, [#allocation6], %s611_s25, %s611_s25, %s612_s26  }
  0x34   :  { %s615_s27 = smov [#allocation8]   ;;  %s558_s5 = scalar_lea.hbm %s717_s3, 1152 }
  0x35   :  { %s52_s28 = sshll.u32 %s615_s27, 4  ;;  %p559_p10 = scmp.ne.s32.totalorder %s717_s3, %s558_s5  ;;  %s53_s28 = int_to_ptr.vmem [resolvable:$true] %s52_s28 }
  0x36   :  { %p562_p11 = scmp.lt.u32.totalorder %s558_s5, %s717_s3 }
  0x38   :  { %p564_p12 = pnand %p562_p11, %p559_p10 }
  0x3a   :  { %567 = shalt.err (!%p564_p12)
}
  0x3b   :  { %s568_s11 = scalar_lea.vmem %s53_s28, 1152  ;;  %p573_p0 = scmp.lt.s32.totalorder %s53_s28, %s53_s28 }
  0x3c   :  { %p569_p13 = scmp.ne.s32.totalorder %s53_s28, %s568_s11  ;;  %p574_p1 = scmp.lt.s32.totalorder %s568_s11, %s568_s11 }
  0x3e   :  { %p575_p2 = por %p574_p1, %p573_p0 }
  0x40   :  { %p576_p3 = pnand %p575_p2, %p569_p13 }
  0x42   :  { %579 = shalt.err (!%p576_p3)
}
  0x43   :  { %58 = dma.hbm_to_vmem [thread:$0]  %s717_s3, 1152, %s53_s28, [#allocation9], %s611_s25, %s611_s25, %s612_s26  }
  0x44   :  { %602 = dma.done.wait [#allocation3], 32  }
  0x45   :  { %603 = vsyncadd [#allocation3], 4294967264 }
  0x46   :  { %604 = dma.done.wait [#allocation6], 896  }
  0x47   :  { %605 = vsyncadd [#allocation6], 4294966400 }
  0x48   :  { %606 = dma.done.wait [#allocation9], 1152  }
  0x49   :  { %607 = vsyncadd [#allocation9], 4294966144  ;;  %v616_v0 = vmov 0.0   ;;  %vm617_vm0 = vmmov 0   ;;  %vm75_vm1 = vcmask 64512   ;;  %v72_v1 = vld [vmem:[#allocation5] sm:$0xff] }
  0x4a   :  { %425 = vmatprep.subr.mxu1 %v616_v0  ;;  %427 = vmatprep.mubr.msk.f32.mxu1 %vm617_vm0, %v616_v0  ;;  %v71_v2 = vld [vmem:[#allocation2] sm:$0x3]  ;;  %v183_v3 = vld [vmem:[#allocation7] sm:$0xff]  ;;  %v618_v6 = vmov 0.0|0.0   ;;  %v185_v7 = vld [vmem:[#allocation7 + $0x10] sm:$0xff]  ;;  %vm149_vm2 = vcmask 254976  }
  0x4b   :  { %457 = vmatprep.mubr.msk.f32.mxu0 %vm617_vm0, %v616_v0  ;;  %426 = vmatpush3.msra.mxu1 %v72_v1  ;;  %v184_v4 = vld [vmem:[#allocation7 + $0x8] sm:$0xff]  ;;  %v186_v8 = vld [vmem:[#allocation7 + $0x18] sm:$0xff]  ;;  %vm189_vm3 = vcmask 261120   ;;  %v297_v39 = vld [vmem:[#allocation8 + $0x8] sm:$0xff]  ;;  %vm263_vm4 = vcmask 517120   ;;  %vm309_vm5 = vcmask 523264  }
  0x4c   :  { %428 = vmatmul.mubr.msk.f32.vlgmr.msra.gmra.mrb[0].mxu1 %vm75_vm1, %v71_v2  ;;  %v461_v5 = vpack.c.bf16 %v184_v4, %v183_v3  ;;  %460 = vmatprep.subr.bf16.mxu1 %v618_v6  ;;  %v464_v9 = vpack.c.bf16 %v186_v8, %v185_v7  ;;  %v402_v32 = vld [vmem:[#allocation5 + $0x8] ss:$0 sm:$0xff]  ;;  %v403_v34 = vld [vmem:[#allocation5 + $0x9] ss:$0 sm:$0xff]  ;;  %v296_v38 = vld [vmem:[#allocation8] sm:$0xff]  ;;  %s619_s3 = smov [#allocation10]  }
  0x4d   :  { %438 = vmatprep.mubr.msk.f32.mxu1 %vm617_vm0, %v616_v0  ;;  %466 = vmatprep.subr.bf16.mxu0 %v618_v6  ;;  %v467_v40 = vpack.c.bf16 %v297_v39, %v296_v38  ;;  %v298_v41 = vld [vmem:[#allocation8 + $0x10] sm:$0xff]  ;;  %v299_v42 = vld [vmem:[#allocation8 + $0x18] sm:$0xff]  ;;  %v300_v44 = vld [vmem:[#allocation8 + $0x20] sm:$0xff]  ;;  %s390_s25 = sshll.u32 %s619_s3, 4  ;;  %s391_s25 = int_to_ptr.vmem [resolvable:$true] %s390_s25 }
  0x4e   :  { %462 = vmatpush3.bf16.msra.mxu1 %v461_v5  ;;  %v470_v43 = vpack.c.bf16 %v299_v42, %v298_v41  ;;  %v301_v45 = vld [vmem:[#allocation8 + $0x28] sm:$0xff]  ;;  %v302_v47 = vld [vmem:[#allocation8 + $0x30] sm:$0xff]  ;;  %v303_v48 = vld [vmem:[#allocation8 + $0x38] sm:$0xff]  ;;  %s580_s26 = scalar_lea.vmem %s391_s25, 32  ;;  %p585_p5 = scmp.lt.s32.totalorder %s391_s25, %s391_s25 }
  0x4f   :  { %463 = vmatprep.subr.bf16.mxu1 %v618_v6  ;;  %468 = vmatpush3.bf16.msra.mxu0 %v467_v40  ;;  %v473_v46 = vpack.c.bf16 %v301_v45, %v300_v44  ;;  %v476_v49 = vpack.c.bf16 %v303_v48, %v302_v47  ;;  %v405_v8 = vld [vmem:[#allocation7 + $0x20] ss:$0 sm:$0xff]  ;;  %p581_p4 = scmp.ne.s32.totalorder %s391_s25, %s580_s26  ;;  %p586_p6 = scmp.lt.s32.totalorder %s580_s26, %s580_s26 }
  0x50   :  { %469 = vmatprep.subr.bf16.mxu0 %v618_v6 }
  0x51   :  { %p587_p7 = por %p586_p6, %p585_p5 }
  0x52   :  { %465 = vmatpush3.bf16.msra.mxu1 %v464_v9 }
  0x53   :  { %471 = vmatpush3.bf16.msra.mxu0 %v470_v43  ;;  %p588_p8 = pnand %p587_p7, %p581_p4 }
  0x54   :  { %472 = vmatprep.subr.bf16.mxu0 %v618_v6 }
  0x57   :  { %474 = vmatpush3.bf16.msra.mxu0 %v473_v46 }
  0x58   :  { %475 = vmatprep.subr.bf16.mxu0 %v618_v6 }
  0x5b   :  { %477 = vmatpush3.bf16.msra.mxu0 %v476_v49 }
 0x11f   :  { %v145_v10 = vpop.f32.mrb[0].mxu1 }
 0x120   :  { %v150_v11 = vsel %vm149_vm2, %v145_v10, 0.0  ;;  %v429_v12 = vpop.f32.mrb[1].mxu1 }
 0x121   :  { %v151_v13 = vrot.slane %v150_v11, 4 }
 0x123   :  { %v152_v14 = vadd.f32 %v151_v13, %v150_v11 }
 0x125   :  { %v153_v15 = vrot.slane %v152_v14, 2 }
 0x127   :  { %v154_v16 = vadd.f32 %v153_v15, %v152_v14  ;;  %v407_v14 = vld [vmem:[#allocation8 + $0x40] ss:$0 sm:$0xff] }
 0x129   :  { %v155_v17 = vrot.slane %v154_v16, 1 }
 0x12b   :  { %v156_v18 = vadd.f32 %v155_v17, %v154_v16 }
 0x12d   :  { %v158_v19 = vmul.f32 0.5, %v156_v18 }
 0x12f   :  { %v159_v20 = vsub.f32 %v145_v10, %v158_v19  ;;  %v406_v10 = vld [vmem:[#allocation7 + $0x21] ss:$0 sm:$0xff] }
 0x131   :  { %v160_v21 = vmul.f32 %v159_v20, %v159_v20 }
 0x133   :  { %v161_v22 = vsel %vm149_vm2, %v160_v21, 0.0 }
 0x134   :  { %v162_v23 = vrot.slane %v161_v22, 4 }
 0x136   :  { %v163_v24 = vadd.f32 %v162_v23, %v161_v22 }
 0x138   :  { %v164_v25 = vrot.slane %v163_v24, 2 }
 0x13a   :  { %v165_v26 = vadd.f32 %v164_v25, %v163_v24 }
 0x13c   :  { %v166_v27 = vrot.slane %v165_v26, 1 }
 0x13e   :  { %v167_v28 = vadd.f32 %v166_v27, %v165_v26 }
 0x140   :  { %v168_v29 = vmul.f32 0.5, %v167_v28 }
 0x142   :  { %v169_v30 = vadd.f32 1e-05, %v168_v29 }
 0x144   :  { %488 = vrsqrt.f32 %v169_v30 }
 0x14e   :  { %v489_v31 = vpop.eup %488 }
 0x14f   :  { %v171_v33 = vmul.f32 %v489_v31, %v159_v20 }
 0x151   :  { %v176_v35 = vmul.f32 %v402_v32, %v171_v33 }
 0x153   :  { %v181_v36 = vadd.f32 %v403_v34, %v176_v35 }
 0x155   :  { %v182_v37 = vmax.f32 %v181_v36, 0.0 }
 0x157   :  { %439 = vmatmul.mubr.msk.f32.vlgmr.msra.gmra.mrb[2].mxu1 %vm189_vm3, %v182_v37 }
 0x22a   :  { %v259_v50 = vpop.f32.mrb[2].mxu1 }
 0x22b   :  { %v264_v51 = vsel %vm263_vm4, %v259_v50, 0.0  ;;  %v440_v52 = vpop.f32.mrb[3].mxu1 }
 0x22c   :  { %v265_v53 = vrot.slane %v264_v51, 4 }
 0x22e   :  { %v266_v54 = vadd.f32 %v265_v53, %v264_v51 }
 0x230   :  { %v267_v55 = vrot.slane %v266_v54, 2 }
 0x232   :  { %v268_v56 = vadd.f32 %v267_v55, %v266_v54 }
 0x234   :  { %v269_v57 = vrot.slane %v268_v56, 1 }
 0x236   :  { %v270_v58 = vadd.f32 %v269_v57, %v268_v56 }
 0x238   :  { %v271_v59 = vmul.f32 0.5, %v270_v58 }
 0x23a   :  { %v272_v60 = vsub.f32 %v259_v50, %v271_v59 }
 0x23c   :  { %v273_v61 = vmul.f32 %v272_v60, %v272_v60 }
 0x23e   :  { %v274_v62 = vsel %vm263_vm4, %v273_v61, 0.0 }
 0x23f   :  { %v275_v63 = vrot.slane %v274_v62, 4 }
 0x241   :  { %v276_v0 = vadd.f32 %v275_v63, %v274_v62 }
 0x243   :  { %v277_v1 = vrot.slane %v276_v0, 2 }
 0x245   :  { %v278_v2 = vadd.f32 %v277_v1, %v276_v0 }
 0x247   :  { %v279_v3 = vrot.slane %v278_v2, 1 }
 0x249   :  { %v280_v4 = vadd.f32 %v279_v3, %v278_v2 }
 0x24b   :  { %v281_v5 = vmul.f32 0.5, %v280_v4 }
 0x24d   :  { %v282_v6 = vadd.f32 1e-05, %v281_v5 }
 0x24f   :  { %490 = vrsqrt.f32 %v282_v6 }
 0x259   :  { %v491_v7 = vpop.eup %490 }
 0x25a   :  { %v284_v9 = vmul.f32 %v491_v7, %v272_v60 }
 0x25c   :  { %v289_v11 = vmul.f32 %v405_v8, %v284_v9 }
 0x25e   :  { %v294_v12 = vadd.f32 %v406_v10, %v289_v11 }
 0x260   :  { %v295_v13 = vmax.f32 %v294_v12, 0.0 }
 0x262   :  { %458 = vmatmul.mubr.msk.f32.vlgmr.msra.gmra.mrb[0].mxu0 %vm309_vm5, %v295_v13 }
 0x335   :  { %v379_v15 = vpop.f32.mrb[0].mxu0 }
 0x336   :  { %v380_v16 = vadd.f32 %v407_v14, %v379_v15  ;;  %v459_v17 = vpop.f32.mrb[1].mxu0 }
 0x338   :  { %383 = vst [vmem:[#allocation10] sm:$0x3] %v380_v16 }
 0x339   :  { %591 = shalt.err (!%p588_p8)
}
 0x33a   :  { %s592_s1 = scalar_lea.hbm %s718_s4, 32 }
 0x33b   :  { %p593_p9 = scmp.ne.s32.totalorder %s718_s4, %s592_s1  ;;  %p596_p10 = scmp.lt.u32.totalorder %s592_s1, %s718_s4 }
 0x33d   :  { %p598_p11 = pnand %p596_p10, %p593_p9 }
 0x33f   :  { %601 = shalt.err (!%p598_p11)
}
 0x340   :  { %393 = dma.vmem_to_hbm [thread:$0]  %s391_s25, 32, %s718_s4, [#allocation4]  }
 0x341   :  { %608 = dma.done.wait [#allocation4], 32  }
 0x342   :  { %609 = vsyncadd [#allocation4], 4294967264 }
 0x343   :  { %397 = vsyncpa [#allocation3], 1 }
 0x344   :  { %398 = vsyncpa [#allocation6], 1 }
 0x345   :  { %399 = vsyncpa [#allocation9], 1 }
 0x346   :  { %400 = vsyncpa [#allocation4], 1 }

</bundles_post_ra>
